<compile_context>
chip_gen: v6e
topology: v6e:2x2x1
jax: 0.10.0
libtpu: 0.0.40
codegen_flags: <defaults>
</compile_context>

<pallas_src>
import jax
import jax.numpy as jnp
from jax.experimental import pallas as pl
from jax.experimental.pallas import tpu as pltpu


def _dct_matrix(n):
    """Orthonormal DCT-II matrix D (n x n): D[k, i] = s_k * cos(pi*(2i+1)*k/(2n))."""
    k = jnp.arange(n, dtype=jnp.float32)[:, None]
    i = jnp.arange(n, dtype=jnp.float32)[None, :]
    basis = jnp.cos(jnp.pi * (2.0 * i + 1.0) * k / (2.0 * n))
    scale = jnp.where(k == 0, jnp.sqrt(1.0 / n), jnp.sqrt(2.0 / n))
    return (scale * basis).astype(jnp.float32)


def _pick_row_block(n_rows, row_bytes, target_bytes):
    """Rows per block: multiple of 8 (sublane tile), sized to ~target_bytes.

    Prefers >= 2 grid steps so both v7x TensorCores are used ('parallel' axis).
    If the block does not divide n_rows, Pallas clips the boundary block.
    """
    r = (target_bytes // max(int(row_bytes), 1)) // 8 * 8
    r = max(8, r)
    if r >= n_rows:
        r = n_rows
        if n_rows >= 16:
            half = ((n_rows // 2 + 7) // 8) * 8
            if 8 <= half < n_rows:
                r = half
    return r


# ----------------------------------------------------------------------------
# Kronecker path (small H*W): two tall matmuls per block, lane-dense layout.
# ----------------------------------------------------------------------------
def _kron_kernel(x_ref, kt_ref, k_ref, omr_ref, a_ref, o_ref):
    # x_ref: (R, HW) flattened images; kt/k: (HW, HW); omr: (1, HW) = 1-r; a: (R, 1)
    X = jnp.dot(x_ref[...], kt_ref[...], preferred_element_type=jnp.float32)
    coef = 1.0 - a_ref[...] * omr_ref[...]          # (R, HW), built once per step
    out = jnp.dot(X * coef, k_ref[...], preferred_element_type=jnp.float32)
    o_ref[...] = out.astype(o_ref.dtype)


def _kron_call(x2, a2, omr2, dh, dw, *, block_bytes, vmem_limit_bytes):
    N, HW = x2.shape
    k = jnp.kron(dh, dw)                 # (HW, HW): row = k*W + l, col = h*W + w
    kt = k.T
    R = _pick_row_block(N, HW * 4, block_bytes)
    grid = (pl.cdiv(N, R),)

    def const(shape):
        return pl.BlockSpec(shape, lambda i: (0, 0), pipeline_mode=pl.Buffered(1))

    cost = pl.CostEstimate(
        flops=4 * N * HW * HW, transcendentals=0,
        bytes_accessed=(2 * N * HW + 2 * HW * HW + HW + N) * 4)

    return pl.pallas_call(
        _kron_kernel,
        out_shape=jax.ShapeDtypeStruct((N, HW), x2.dtype),
        grid_spec=pltpu.PrefetchScalarGridSpec(
            num_scalar_prefetch=0,
            grid=grid,
            in_specs=[
                pl.BlockSpec((R, HW), lambda i: (i, 0)),   # x rows
                const((HW, HW)),                           # K^T (forward 2-D DCT)
                const((HW, HW)),                           # K   (inverse 2-D DCT)
                const((1, HW)),                            # 1 - r, flattened
                pl.BlockSpec((R, 1), lambda i: (i, 0)),    # per-row alpha
            ],
            out_specs=pl.BlockSpec((R, HW), lambda i: (i, 0)),
        ),
        compiler_params=pltpu.CompilerParams(
            dimension_semantics=("parallel",),
            vmem_limit_bytes=vmem_limit_bytes,
        ),
        cost_estimate=cost,
    )(x2, kt, k, omr2, a2)


# ----------------------------------------------------------------------------
# Separable path (large H*W): four tall batched matmuls + one transposed pass.
# ----------------------------------------------------------------------------
def _sep_kernel(x_ref, dwt_ref, dht_ref, dh_ref, dw_ref, omrT_ref, a_ref, o_ref):
    R, H, W = x_ref.shape
    # W-axis forward DCT on the whole block:   (R*H, W) @ (W, W)
    t = jnp.dot(x_ref[...].reshape(R * H, W), dwt_ref[...],
                preferred_element_type=jnp.float32)
    # One minor-dim transpose so both H-axis transforms are single tall matmuls.
    tT = jnp.swapaxes(t.reshape(R, H, W), 1, 2)                  # (R, W, H)
    X = jnp.dot(tT.reshape(R * W, H), dht_ref[...],
                preferred_element_type=jnp.float32)              # H forward
    coefT = 1.0 - a_ref[...] * omrT_ref[...]                     # (R, W, H), once/step
    Xm = X.reshape(R, W, H) * coefT
    y = jnp.dot(Xm.reshape(R * W, H), dh_ref[...],
                preferred_element_type=jnp.float32)              # H inverse
    yT = jnp.swapaxes(y.reshape(R, W, H), 1, 2).reshape(R * H, W)
    out = jnp.dot(yT, dw_ref[...], preferred_element_type=jnp.float32)  # W inverse
    o_ref[...] = out.reshape(R, H, W).astype(o_ref.dtype)


def _sep_call(x3, a3, omrT, dh, dw, *, block_bytes, vmem_limit_bytes):
    N, H, W = x3.shape
    R = _pick_row_block(N, H * W * 4, block_bytes)
    grid = (pl.cdiv(N, R),)

    def const(shape):
        return pl.BlockSpec(shape, lambda i: (0, 0), pipeline_mode=pl.Buffered(1))

    cost = pl.CostEstimate(
        flops=4 * N * H * W * (H + W), transcendentals=0,
        bytes_accessed=(2 * N * H * W + 2 * H * H + 2 * W * W + H * W + N) * 4)

    return pl.pallas_call(
        _sep_kernel,
        out_shape=jax.ShapeDtypeStruct((N, H, W), x3.dtype),
        grid_spec=pltpu.PrefetchScalarGridSpec(
            num_scalar_prefetch=0,
            grid=grid,
            in_specs=[
                pl.BlockSpec((R, H, W), lambda i: (i, 0, 0)),   # x rows (images)
                const((W, W)),                                  # D_W^T
                const((H, H)),                                  # D_H^T
                const((H, H)),                                  # D_H
                const((W, W)),                                  # D_W
                const((W, H)),                                  # (1 - r)^T
                pl.BlockSpec((R, 1, 1), lambda i: (i, 0, 0)),   # per-row alpha
            ],
            out_specs=pl.BlockSpec((R, H, W), lambda i: (i, 0, 0)),
        ),
        compiler_params=pltpu.CompilerParams(
            dimension_semantics=("parallel",),
            vmem_limit_bytes=vmem_limit_bytes,
        ),
        cost_estimate=cost,
    )(x3, dw.T, dh.T, dh, dw, omrT, a3)


# ----------------------------------------------------------------------------
# Public wrapper.
# ----------------------------------------------------------------------------
def dct_drop_unit(x, alpha, *, block_bytes=2 << 20, max_kron_hw=256,
                  vmem_limit_bytes=48 * 1024 * 1024):
    """x: (B, C, H, W) float32; alpha: (C,) or (C, 1, 1) float32."""
    B, C, H, W = x.shape
    N, HW = B * C, H * W

    dh = _dct_matrix(H)
    dw = _dct_matrix(W)

    ys = jnp.linspace(-1.0, 1.0, H, dtype=jnp.float32)
    xs = jnp.linspace(-1.0, 1.0, W, dtype=jnp.float32)
    one_minus_r = 1.0 - jnp.sqrt(xs[None, :] ** 2 + ys[:, None] ** 2)   # (H, W)

    # Per-row (= per (b, c)) alpha; row index is b*C + c.
    a_rows = jnp.tile(jnp.asarray(alpha, jnp.float32).reshape(C), (B,))  # (N,)

    if HW <= max_kron_hw:
        out2 = _kron_call(
            x.reshape(N, HW), a_rows.reshape(N, 1), one_minus_r.reshape(1, HW),
            dh, dw, block_bytes=block_bytes, vmem_limit_bytes=vmem_limit_bytes)
        return out2.reshape(B, C, H, W)

    out3 = _sep_call(
        x.reshape(N, H, W), a_rows.reshape(N, 1, 1), one_minus_r.T,
        dh, dw, block_bytes=block_bytes, vmem_limit_bytes=vmem_limit_bytes)
    return out3.reshape(B, C, H, W)


def dct_drop_unit_ref(x, alpha):
    """Pure-JAX reference mirroring the PyTorch forward (ortho DCT-II / DCT-III)."""
    B, C, H, W = x.shape
    dh = _dct_matrix(H)
    dw = _dct_matrix(W)
    X = jnp.einsum('kh,bchw,lw->bckl', dh, x, dw, precision='highest')
    ys = jnp.linspace(-1.0, 1.0, H, dtype=jnp.float32)
    xs = jnp.linspace(-1.0, 1.0, W, dtype=jnp.float32)
    r = jnp.sqrt(xs[None, :] ** 2 + ys[:, None] ** 2)                   # (H, W)
    a = jnp.asarray(alpha, dtype=jnp.float32).reshape(1, C, 1, 1)
    Xm = X * (1.0 - a) + X * a * r[None, None]
    out = jnp.einsum('kh,bckl,lw->bchw', dh, Xm, dw, precision='highest')
    return out.astype(x.dtype)


if __name__ == "__main__":
    key = jax.random.PRNGKey(0)
    # First two configs take the lane-dense Kronecker path (one of them with a
    # 2-step grid); the last (H*W > 256) takes the batched separable path.
    # Non-square spatial dims so H/W-transposition bugs would be caught.
    configs = [(2, 4, 16, 16), (2, 16, 16, 8), (2, 4, 32, 16)]
    for (B, C, H, W) in configs:
        key, kx, ka = jax.random.split(key, 3)
        x = jax.random.normal(kx, (B, C, H, W), dtype=jnp.float32)
        # PyTorch init is alpha == 0.5; perturb per channel so the per-channel
        # path is genuinely exercised.  Parameter shape matches nn.Parameter.
        alpha = (0.5 + 0.1 * jax.random.normal(ka, (C,), dtype=jnp.float32)
                 ).reshape(C, 1, 1)

        out = jax.block_until_ready(dct_drop_unit(x, alpha))
        ref = dct_drop_unit_ref(x, alpha)

        assert out.shape == (B, C, H, W)
        max_err = float(jnp.max(jnp.abs(out - ref)))
        assert max_err < 2e-4, f"mismatch at {(B, C, H, W)}: {max_err}"

    print("KERNEL_OK")
</pallas_src>

<mosaic_0001>
module attributes {stable_mosaic.version = 11 : i64} {
  func.func @_kron_kernel(%arg0: i32, %arg1: memref<8x256xf32, #tpu.memory_space<vmem>>, %arg2: memref<256x256xf32, #tpu.memory_space<vmem>>, %arg3: memref<256x256xf32, #tpu.memory_space<vmem>>, %arg4: memref<1x256xf32, #tpu.memory_space<vmem>>, %arg5: memref<8x1xf32, #tpu.memory_space<vmem>>, %arg6: memref<8x256xf32, #tpu.memory_space<vmem>>) attributes {dimension_semantics = [#tpu.dimension_semantics<parallel>], iteration_bounds = array<i64: 1>, scalar_prefetch = 0 : i64, scratch_operands = 0 : i64, tpu.core_type = #tpu.core_type<tc>, window_params = [{transform_indices = @transform_0, window_bounds = array<i64: 8, 256>}, {pipeline_mode = #tpu.pipeline_mode<synchronous>, transform_indices = @transform_1, window_bounds = array<i64: 256, 256>}, {pipeline_mode = #tpu.pipeline_mode<synchronous>, transform_indices = @transform_2, window_bounds = array<i64: 256, 256>}, {pipeline_mode = #tpu.pipeline_mode<synchronous>, transform_indices = @transform_3, window_bounds = array<i64: 1, 256>}, {transform_indices = @transform_4, window_bounds = array<i64: 8, 1>}, {transform_indices = @transform_5, window_bounds = array<i64: 8, 256>}]} {
    %c0 = arith.constant 0 : index
    %c0_0 = arith.constant 0 : index
    %0 = vector.load %arg1[%c0, %c0_0] : memref<8x256xf32, #tpu.memory_space<vmem>>, vector<8x256xf32>
    %c0_1 = arith.constant 0 : index
    %c0_2 = arith.constant 0 : index
    %1 = vector.load %arg2[%c0_1, %c0_2] : memref<256x256xf32, #tpu.memory_space<vmem>>, vector<256x256xf32>
    %cst = arith.constant dense<0.000000e+00> : vector<8x256xf32>
    %2 = tpu.matmul %0, %1, %cst {dimension_numbers = #tpu.dot_dimension_numbers<[1], [0], [0], [1], [0, 0, 1, 1], [], []>} : vector<8x256xf32>, vector<256x256xf32>, vector<8x256xf32> -> vector<8x256xf32>
    %c0_3 = arith.constant 0 : index
    %c0_4 = arith.constant 0 : index
    %3 = vector.load %arg5[%c0_3, %c0_4] : memref<8x1xf32, #tpu.memory_space<vmem>>, vector<8x1xf32>
    %c0_5 = arith.constant 0 : index
    %c0_6 = arith.constant 0 : index
    %4 = vector.load %arg4[%c0_5, %c0_6] : memref<1x256xf32, #tpu.memory_space<vmem>>, vector<1x256xf32>
    %5 = vector.broadcast %3 : vector<8x1xf32> to vector<8x256xf32>
    %6 = vector.broadcast %4 : vector<1x256xf32> to vector<8x256xf32>
    %7 = arith.mulf %5, %6 : vector<8x256xf32>
    %cst_7 = arith.constant 1.000000e+00 : f32
    %8 = vector.broadcast %cst_7 : f32 to vector<8x256xf32>
    %9 = arith.subf %8, %7 : vector<8x256xf32>
    %10 = arith.mulf %2, %9 : vector<8x256xf32>
    %c0_8 = arith.constant 0 : index
    %c0_9 = arith.constant 0 : index
    %11 = vector.load %arg3[%c0_8, %c0_9] : memref<256x256xf32, #tpu.memory_space<vmem>>, vector<256x256xf32>
    %cst_10 = arith.constant dense<0.000000e+00> : vector<8x256xf32>
    %12 = tpu.matmul %10, %11, %cst_10 {dimension_numbers = #tpu.dot_dimension_numbers<[1], [0], [0], [1], [0, 0, 1, 1], [], []>} : vector<8x256xf32>, vector<256x256xf32>, vector<8x256xf32> -> vector<8x256xf32>
    %c0_11 = arith.constant 0 : index
    %c0_12 = arith.constant 0 : index
    %13 = vector.load %arg6[%c0_11, %c0_12] : memref<8x256xf32, #tpu.memory_space<vmem>>, vector<8x256xf32>
    tpu.vector_store %arg6[%c0_11, %c0_12], %12 {strides = array<i32>} : memref<8x256xf32, #tpu.memory_space<vmem>>, vector<8x256xf32>,
    return
  }
  func.func @transform_0(%arg0: i32) -> (i32, i32) {
    %c0_i32 = arith.constant 0 : i32
    %c0_i32_0 = arith.constant 0 : i32
    return %arg0, %c0_i32 : i32, i32
  }
  func.func @transform_1(%arg0: i32) -> (i32, i32) {
    %c0_i32 = arith.constant 0 : i32
    %c0_i32_0 = arith.constant 0 : i32
    %c0_i32_1 = arith.constant 0 : i32
    return %c0_i32, %c0_i32_0 : i32, i32
  }
  func.func @transform_2(%arg0: i32) -> (i32, i32) {
    %c0_i32 = arith.constant 0 : i32
    %c0_i32_0 = arith.constant 0 : i32
    %c0_i32_1 = arith.constant 0 : i32
    return %c0_i32, %c0_i32_0 : i32, i32
  }
  func.func @transform_3(%arg0: i32) -> (i32, i32) {
    %c0_i32 = arith.constant 0 : i32
    %c0_i32_0 = arith.constant 0 : i32
    %c0_i32_1 = arith.constant 0 : i32
    return %c0_i32, %c0_i32_0 : i32, i32
  }
  func.func @transform_4(%arg0: i32) -> (i32, i32) {
    %c0_i32 = arith.constant 0 : i32
    %c0_i32_0 = arith.constant 0 : i32
    return %arg0, %c0_i32 : i32, i32
  }
  func.func @transform_5(%arg0: i32) -> (i32, i32) {
    %c0_i32 = arith.constant 0 : i32
    %c0_i32_0 = arith.constant 0 : i32
    return %arg0, %c0_i32 : i32, i32
  }
}

</mosaic_0001>

<bundles_post_ra>
// kernel: tpu_custom_call.1
= control target key start
LH: loop header
LB: loop body
LE: loop exit
PB: predicated region body
PF: predicated region fallthrough
CT: control target
= control target key end

     0   :  { %10 = vsyncpa [#allocation3], 0  ;;  %s523_s0 = inlined_call_operand.hbm [shape: f32[8,256], index: 0, kind: input, shape index: {}]   ;;  %s524_s1 = inlined_call_operand.hbm [shape: f32[256,256], index: 1, kind: input, shape index: {}]   ;;  %s525_s2 = inlined_call_operand.hbm [shape: f32[256,256], index: 2, kind: input, shape index: {}]   ;;  %s526_s3 = inlined_call_operand.vmem [shape: f32[1,256], index: 3, kind: input, shape index: {}]   ;;  %s527_s4 = inlined_call_operand.vmem [shape: f32[8,1], index: 4, kind: input, shape index: {}]   ;;  %s528_s5 = inlined_call_operand.hbm [shape: f32[8,256], index: 5, kind: output, shape index: {}]  }
   0x1   :  { %11 = vsyncpa [#allocation6], 0 }
   0x2   :  { %12 = vsyncpa [#allocation4], 0  ;;  %s468_s18 = smov [#allocation5]  }
   0x3   :  { %s28_s19 = sshll.u32 %s468_s18, 4  ;;  %s29_s19 = int_to_ptr.vmem [resolvable:$true] %s28_s19 }
   0x4   :  { %s390_s20 = scalar_lea.vmem %s29_s19, 8192  ;;  %p395_p1 = scmp.lt.s32.totalorder %s29_s19, %s29_s19 }
   0x5   :  { %p391_p0 = scmp.ne.s32.totalorder %s29_s19, %s390_s20  ;;  %p396_p2 = scmp.lt.s32.totalorder %s390_s20, %s390_s20 }
   0x7   :  { %p397_p3 = por %p396_p2, %p395_p1 }
   0x9   :  { %p398_p4 = pnand %p397_p3, %p391_p0 }
   0xb   :  { %401 = shalt.err (!%p398_p4)
}
   0xc   :  { %s469_s21 = smov 256   ;;  %s470_s22 = smov 16  }
   0xd   :  { %34 = dma.hbm_to_vmem [thread:$0]  %s524_s1, 8192, %s29_s19, [#allocation6], %s469_s21, %s469_s21, %s470_s22  }
   0xe   :  { %s471_s25 = smov [#allocation2]   ;;  %s472_s27 = smov [#allocation7]  }
   0xf   :  { %s19_s26 = sshll.u32 %s471_s25, 4  ;;  %s40_s28 = sshll.u32 %s472_s27, 4  ;;  %s20_s26 = int_to_ptr.vmem [resolvable:$true] %s19_s26  ;;  %s41_s28 = int_to_ptr.vmem [resolvable:$true] %s40_s28 }
  0x10   :  { %s410_s29 = scalar_lea.vmem %s20_s26, 256  ;;  %p415_p6 = scmp.lt.s32.totalorder %s20_s26, %s20_s26 }
  0x11   :  { %p411_p5 = scmp.ne.s32.totalorder %s20_s26, %s410_s29  ;;  %p416_p7 = scmp.lt.s32.totalorder %s410_s29, %s410_s29 }
  0x13   :  { %p417_p8 = por %p416_p7, %p415_p6 }
  0x15   :  { %p418_p9 = pnand %p417_p8, %p411_p5 }
  0x17   :  { %421 = shalt.err (!%p418_p9)
}
  0x18   :  { %22 = dma.hbm_to_vmem [thread:$0]  %s523_s0, 256, %s20_s26, [#allocation3]  }
  0x19   :  { %s430_s7 = scalar_lea.vmem %s41_s28, 8192  ;;  %p435_p11 = scmp.lt.s32.totalorder %s41_s28, %s41_s28 }
  0x1a   :  { %p431_p10 = scmp.ne.s32.totalorder %s41_s28, %s430_s7  ;;  %p436_p12 = scmp.lt.s32.totalorder %s430_s7, %s430_s7 }
  0x1c   :  { %p437_p13 = por %p436_p12, %p435_p11 }
  0x1e   :  { %p438_p0 = pnand %p437_p13, %p431_p10 }
  0x20   :  { %441 = shalt.err (!%p438_p0)
}
  0x21   :  { %46 = dma.hbm_to_vmem [thread:$0]  %s525_s2, 8192, %s41_s28, [#allocation6], %s469_s21, %s469_s21, %s470_s22  }
  0x22   :  { %462 = dma.done.wait [#allocation3], 256  }
  0x23   :  { %463 = vsyncadd [#allocation3], 4294967040 }
  0x24   :  { %464 = dma.done.wait [#allocation6], 16384  }
  0x25   :  { %465 = vsyncadd [#allocation6], 4294950912  ;;  %v473_v0 = vmov 0   ;;  %v93_v1 = vld [vmem:[#allocation5 + $0xf8] sm:$0xff]  ;;  %v92_v2 = vld [vmem:[#allocation5 + $0xf0] sm:$0xff]  ;;  %s474_s10 = smov [#allocation8]  }
  0x26   :  { %381 = vset.pattern.permute.xlu0 %v473_v0  ;;  %v91_v3 = vld [vmem:[#allocation5 + $0xe8] sm:$0xff]  ;;  %126 = vmatprep.subr.mxu0 %v93_v1  ;;  %v90_v4 = vld [vmem:[#allocation5 + $0xe0] sm:$0xff]  ;;  %v89_v5 = vld [vmem:[#allocation5 + $0xd8] sm:$0xff]  ;;  %s364_s11 = sshll.u32 %s474_s10, 4  ;;  %s365_s11 = int_to_ptr.vmem [resolvable:$true] %s364_s11 }
  0x27   :  { %127 = vmatpush1.msra.mxu0 %v92_v2  ;;  %v88_v6 = vld [vmem:[#allocation5 + $0xd0] sm:$0xff]  ;;  %v87_v7 = vld [vmem:[#allocation5 + $0xc8] sm:$0xff]  ;;  %v86_v8 = vld [vmem:[#allocation5 + $0xc0] sm:$0xff]  ;;  %p447_p2 = scmp.lt.s32.totalorder %s365_s11, %s365_s11 }
  0x28   :  { %128 = vmatprep.subr.mxu0 %v91_v3  ;;  %v85_v9 = vld [vmem:[#allocation5 + $0xb8] sm:$0xff]  ;;  %v84_v10 = vld [vmem:[#allocation5 + $0xb0] sm:$0xff]  ;;  %v83_v11 = vld [vmem:[#allocation5 + $0xa8] sm:$0xff] }
  0x29   :  { %129 = vmatpush1.msra.mxu0 %v90_v4  ;;  %v82_v12 = vld [vmem:[#allocation5 + $0xa0] sm:$0xff]  ;;  %v81_v13 = vld [vmem:[#allocation5 + $0x98] sm:$0xff]  ;;  %v80_v14 = vld [vmem:[#allocation5 + $0x90] sm:$0xff] }
  0x2a   :  { %130 = vmatprep.subr.mxu0 %v89_v5  ;;  %v79_v15 = vld [vmem:[#allocation5 + $0x88] sm:$0xff]  ;;  %v78_v16 = vld [vmem:[#allocation5 + $0x80] sm:$0xff]  ;;  %v77_v17 = vld [vmem:[#allocation5 + $0x78] sm:$0xff] }
  0x2b   :  { %131 = vmatpush1.msra.mxu0 %v88_v6  ;;  %v76_v18 = vld [vmem:[#allocation5 + $0x70] sm:$0xff]  ;;  %v75_v19 = vld [vmem:[#allocation5 + $0x68] sm:$0xff]  ;;  %v74_v20 = vld [vmem:[#allocation5 + $0x60] sm:$0xff] }
  0x2c   :  { %132 = vmatprep.subr.mxu0 %v87_v7  ;;  %v73_v21 = vld [vmem:[#allocation5 + $0x58] sm:$0xff]  ;;  %v72_v22 = vld [vmem:[#allocation5 + $0x50] sm:$0xff]  ;;  %v71_v23 = vld [vmem:[#allocation5 + $0x48] sm:$0xff] }
  0x2d   :  { %133 = vmatpush1.msra.mxu0 %v86_v8  ;;  %v70_v24 = vld [vmem:[#allocation5 + $0x40] sm:$0xff]  ;;  %v69_v25 = vld [vmem:[#allocation5 + $0x38] sm:$0xff]  ;;  %v197_v27 = vld [vmem:[%s527_s4] sm:$0xff] }
  0x2e   :  { %134 = vmatprep.subr.mxu0 %v85_v9  ;;  %v61_v26 = vld [vmem:[#allocation2 + $0x8] sm:$0xff]  ;;  %v251_v29 = vld [vmem:[#allocation7 + $0xf0] sm:$0xff]  ;;  %201 = vperm.xlu0 %381, %v197_v27   ;;  %v250_v31 = vld [vmem:[#allocation7 + $0xe8] sm:$0xff] }
  0x2f   :  { %135 = vmatpush1.msra.mxu0 %v84_v10  ;;  %190 = vmatprep.mubr.f32.mxu0 %v61_v26  ;;  %v252_v28 = vld [vmem:[#allocation7 + $0xf8] sm:$0xff]  ;;  %v68_v30 = vld [vmem:[#allocation5 + $0x30] sm:$0xff]  ;;  %v67_v32 = vld [vmem:[#allocation5 + $0x28] sm:$0xff] }
  0x30   :  { %136 = vmatprep.subr.mxu0 %v83_v11  ;;  %285 = vmatprep.subr.mxu1 %v252_v28  ;;  %v249_v33 = vld [vmem:[#allocation7 + $0xe0] sm:$0xff]  ;;  %v248_v35 = vld [vmem:[#allocation7 + $0xd8] sm:$0xff]  ;;  %v247_v37 = vld [vmem:[#allocation7 + $0xd0] sm:$0xff] }
  0x31   :  { %137 = vmatpush1.msra.mxu0 %v82_v12  ;;  %v66_v34 = vld [vmem:[#allocation5 + $0x20] sm:$0xff]  ;;  %286 = vmatpush1.msra.mxu1 %v251_v29  ;;  %v65_v36 = vld [vmem:[#allocation5 + $0x18] sm:$0xff]  ;;  %v64_v38 = vld [vmem:[#allocation5 + $0x10] sm:$0xff] }
  0x32   :  { %138 = vmatprep.subr.mxu0 %v81_v13  ;;  %287 = vmatprep.subr.mxu1 %v250_v31  ;;  %v246_v39 = vld [vmem:[#allocation7 + $0xc8] sm:$0xff]  ;;  %v245_v41 = vld [vmem:[#allocation7 + $0xc0] sm:$0xff]  ;;  %v244_v43 = vld [vmem:[#allocation7 + $0xb8] sm:$0xff] }
  0x33   :  { %139 = vmatpush1.msra.mxu0 %v80_v14  ;;  %288 = vmatpush1.msra.mxu1 %v249_v33  ;;  %v63_v40 = vld [vmem:[#allocation5 + $0x8] sm:$0xff]  ;;  %v62_v42 = vld [vmem:[#allocation5] sm:$0xff]  ;;  %v125_v44 = vld [vmem:[#allocation5 + $0x1f8] sm:$0xff] }
  0x34   :  { %140 = vmatprep.subr.mxu0 %v79_v15  ;;  %289 = vmatprep.subr.mxu1 %v248_v35  ;;  %v243_v45 = vld [vmem:[#allocation7 + $0xb0] sm:$0xff]  ;;  %v242_v47 = vld [vmem:[#allocation7 + $0xa8] sm:$0xff]  ;;  %v241_v49 = vld [vmem:[#allocation7 + $0xa0] sm:$0xff] }
  0x35   :  { %141 = vmatpush1.msra.mxu0 %v78_v16  ;;  %290 = vmatpush1.msra.mxu1 %v247_v37  ;;  %v124_v46 = vld [vmem:[#allocation5 + $0x1f0] sm:$0xff]  ;;  %v123_v48 = vld [vmem:[#allocation5 + $0x1e8] sm:$0xff]  ;;  %v122_v50 = vld [vmem:[#allocation5 + $0x1e0] sm:$0xff] }
  0x36   :  { %142 = vmatprep.subr.mxu0 %v77_v17  ;;  %291 = vmatprep.subr.mxu1 %v246_v39  ;;  %v240_v51 = vld [vmem:[#allocation7 + $0x98] sm:$0xff]  ;;  %v239_v53 = vld [vmem:[#allocation7 + $0x90] sm:$0xff]  ;;  %v238_v55 = vld [vmem:[#allocation7 + $0x88] sm:$0xff] }
  0x37   :  { %143 = vmatpush1.msra.mxu0 %v76_v18  ;;  %292 = vmatpush1.msra.mxu1 %v245_v41  ;;  %v121_v52 = vld [vmem:[#allocation5 + $0x1d8] sm:$0xff]  ;;  %v120_v54 = vld [vmem:[#allocation5 + $0x1d0] sm:$0xff]  ;;  %v119_v56 = vld [vmem:[#allocation5 + $0x1c8] sm:$0xff] }
  0x38   :  { %144 = vmatprep.subr.mxu0 %v75_v19  ;;  %293 = vmatprep.subr.mxu1 %v244_v43  ;;  %v237_v57 = vld [vmem:[#allocation7 + $0x80] sm:$0xff]  ;;  %v236_v59 = vld [vmem:[#allocation7 + $0x78] sm:$0xff]  ;;  %v235_v61 = vld [vmem:[#allocation7 + $0x70] sm:$0xff] }
  0x39   :  { %145 = vmatpush1.msra.mxu0 %v74_v20  ;;  %294 = vmatpush1.msra.mxu1 %v243_v45  ;;  %v118_v58 = vld [vmem:[#allocation5 + $0x1c0] sm:$0xff]  ;;  %v117_v60 = vld [vmem:[#allocation5 + $0x1b8] sm:$0xff]  ;;  %v116_v62 = vld [vmem:[#allocation5 + $0x1b0] sm:$0xff] }
  0x3a   :  { %146 = vmatprep.subr.mxu0 %v73_v21  ;;  %295 = vmatprep.subr.mxu1 %v242_v47  ;;  %v234_v63 = vld [vmem:[#allocation7 + $0x68] sm:$0xff]  ;;  %v233_v1 = vld [vmem:[#allocation7 + $0x60] sm:$0xff]  ;;  %v232_v3 = vld [vmem:[#allocation7 + $0x58] sm:$0xff] }
  0x3b   :  { %147 = vmatpush1.msra.mxu0 %v72_v22  ;;  %296 = vmatpush1.msra.mxu1 %v241_v49  ;;  %v115_v0 = vld [vmem:[#allocation5 + $0x1a8] sm:$0xff]  ;;  %v114_v2 = vld [vmem:[#allocation5 + $0x1a0] sm:$0xff]  ;;  %v113_v4 = vld [vmem:[#allocation5 + $0x198] sm:$0xff] }
  0x3c   :  { %148 = vmatprep.subr.mxu0 %v71_v23  ;;  %297 = vmatprep.subr.mxu1 %v240_v51  ;;  %v231_v5 = vld [vmem:[#allocation7 + $0x50] sm:$0xff]  ;;  %v230_v7 = vld [vmem:[#allocation7 + $0x48] sm:$0xff]  ;;  %v229_v9 = vld [vmem:[#allocation7 + $0x40] sm:$0xff] }
  0x3d   :  { %149 = vmatpush1.msra.mxu0 %v70_v24  ;;  %298 = vmatpush1.msra.mxu1 %v239_v53  ;;  %v112_v6 = vld [vmem:[#allocation5 + $0x190] sm:$0xff]  ;;  %v111_v8 = vld [vmem:[#allocation5 + $0x188] sm:$0xff]  ;;  %v110_v10 = vld [vmem:[#allocation5 + $0x180] sm:$0xff] }
  0x3e   :  { %150 = vmatprep.subr.mxu0 %v69_v25  ;;  %299 = vmatprep.subr.mxu1 %v238_v55  ;;  %v228_v11 = vld [vmem:[#allocation7 + $0x38] sm:$0xff]  ;;  %v227_v13 = vld [vmem:[#allocation7 + $0x30] sm:$0xff]  ;;  %v226_v15 = vld [vmem:[#allocation7 + $0x28] sm:$0xff] }
  0x3f   :  { %151 = vmatpush1.msra.mxu0 %v68_v30  ;;  %300 = vmatpush1.msra.mxu1 %v237_v57  ;;  %v109_v12 = vld [vmem:[#allocation5 + $0x178] sm:$0xff]  ;;  %v108_v14 = vld [vmem:[#allocation5 + $0x170] sm:$0xff]  ;;  %v107_v16 = vld [vmem:[#allocation5 + $0x168] sm:$0xff] }
  0x40   :  { %152 = vmatprep.subr.mxu0 %v67_v32  ;;  %301 = vmatprep.subr.mxu1 %v236_v59  ;;  %v225_v17 = vld [vmem:[#allocation7 + $0x20] sm:$0xff]  ;;  %v224_v19 = vld [vmem:[#allocation7 + $0x18] sm:$0xff]  ;;  %v223_v21 = vld [vmem:[#allocation7 + $0x10] sm:$0xff] }
  0x41   :  { %153 = vmatpush1.msra.mxu0 %v66_v34  ;;  %302 = vmatpush1.msra.mxu1 %v235_v61  ;;  %v106_v18 = vld [vmem:[#allocation5 + $0x160] sm:$0xff]  ;;  %v105_v20 = vld [vmem:[#allocation5 + $0x158] sm:$0xff]  ;;  %v104_v22 = vld [vmem:[#allocation5 + $0x150] sm:$0xff] }
  0x42   :  { %154 = vmatprep.subr.mxu0 %v65_v36  ;;  %303 = vmatprep.subr.mxu1 %v234_v63  ;;  %v222_v23 = vld [vmem:[#allocation7 + $0x8] sm:$0xff]  ;;  %v221_v25 = vld [vmem:[#allocation7] sm:$0xff]  ;;  %v284_v27 = vld [vmem:[#allocation7 + $0x1f8] sm:$0xff] }
  0x43   :  { %155 = vmatpush1.msra.mxu0 %v64_v38  ;;  %304 = vmatpush1.msra.mxu1 %v233_v1  ;;  %v103_v24 = vld [vmem:[#allocation5 + $0x148] sm:$0xff]  ;;  %v102_v26 = vld [vmem:[#allocation5 + $0x140] sm:$0xff]  ;;  %v101_v28 = vld [vmem:[#allocation5 + $0x138] sm:$0xff] }
  0x44   :  { %156 = vmatprep.subr.mxu0 %v63_v40  ;;  %305 = vmatprep.subr.mxu1 %v232_v3  ;;  %v283_v29 = vld [vmem:[#allocation7 + $0x1f0] sm:$0xff]  ;;  %v282_v31 = vld [vmem:[#allocation7 + $0x1e8] sm:$0xff]  ;;  %v281_v33 = vld [vmem:[#allocation7 + $0x1e0] sm:$0xff] }
  0x45   :  { %157 = vmatpush1.msra.mxu0 %v62_v42  ;;  %306 = vmatpush1.msra.mxu1 %v231_v5  ;;  %v100_v30 = vld [vmem:[#allocation5 + $0x130] sm:$0xff]  ;;  %v99_v32 = vld [vmem:[#allocation5 + $0x128] sm:$0xff]  ;;  %v98_v34 = vld [vmem:[#allocation5 + $0x120] sm:$0xff] }
  0x46   :  { %158 = vmatprep.subr.mxu0 %v125_v44  ;;  %307 = vmatprep.subr.mxu1 %v230_v7  ;;  %v280_v35 = vld [vmem:[#allocation7 + $0x1d8] sm:$0xff]  ;;  %v279_v37 = vld [vmem:[#allocation7 + $0x1d0] sm:$0xff]  ;;  %v278_v39 = vld [vmem:[#allocation7 + $0x1c8] sm:$0xff] }
  0x47   :  { %159 = vmatpush2.msra.mxu0 %v124_v46  ;;  %308 = vmatpush1.msra.mxu1 %v229_v9  ;;  %v97_v36 = vld [vmem:[#allocation5 + $0x118] sm:$0xff]  ;;  %v96_v38 = vld [vmem:[#allocation5 + $0x110] sm:$0xff]  ;;  %v95_v40 = vld [vmem:[#allocation5 + $0x108] sm:$0xff] }
  0x48   :  { %160 = vmatprep.subr.mxu0 %v123_v48  ;;  %309 = vmatprep.subr.mxu1 %v228_v11  ;;  %v277_v41 = vld [vmem:[#allocation7 + $0x1c0] sm:$0xff]  ;;  %v276_v43 = vld [vmem:[#allocation7 + $0x1b8] sm:$0xff]  ;;  %v60_v44 = vld [vmem:[#allocation2] sm:$0xff] }
  0x49   :  { %161 = vmatpush2.msra.mxu0 %v122_v50  ;;  %310 = vmatpush1.msra.mxu1 %v227_v13  ;;  %v94_v42 = vld [vmem:[#allocation5 + $0x100] sm:$0xff]  ;;  %v275_v45 = vld [vmem:[#allocation7 + $0x1b0] sm:$0xff]  ;;  %v274_v46 = vld [vmem:[#allocation7 + $0x1a8] sm:$0xff] }
  0x4a   :  { %162 = vmatprep.subr.mxu0 %v121_v52  ;;  %311 = vmatprep.subr.mxu1 %v226_v15  ;;  %v273_v47 = vld [vmem:[#allocation7 + $0x1a0] sm:$0xff]  ;;  %v272_v48 = vld [vmem:[#allocation7 + $0x198] sm:$0xff]  ;;  %v271_v49 = vld [vmem:[#allocation7 + $0x190] sm:$0xff] }
  0x4b   :  { %163 = vmatpush2.msra.mxu0 %v120_v54  ;;  %312 = vmatpush1.msra.mxu1 %v225_v17  ;;  %v270_v50 = vld [vmem:[#allocation7 + $0x188] sm:$0xff]  ;;  %v269_v51 = vld [vmem:[#allocation7 + $0x180] sm:$0xff]  ;;  %v268_v52 = vld [vmem:[#allocation7 + $0x178] sm:$0xff] }
  0x4c   :  { %164 = vmatprep.subr.mxu0 %v119_v56  ;;  %313 = vmatprep.subr.mxu1 %v224_v19  ;;  %v267_v53 = vld [vmem:[#allocation7 + $0x170] sm:$0xff]  ;;  %v266_v54 = vld [vmem:[#allocation7 + $0x168] sm:$0xff]  ;;  %v265_v55 = vld [vmem:[#allocation7 + $0x160] sm:$0xff] }
  0x4d   :  { %165 = vmatpush2.msra.mxu0 %v118_v58  ;;  %314 = vmatpush1.msra.mxu1 %v223_v21  ;;  %v264_v56 = vld [vmem:[#allocation7 + $0x158] sm:$0xff]  ;;  %v263_v57 = vld [vmem:[#allocation7 + $0x150] sm:$0xff]  ;;  %v262_v58 = vld [vmem:[#allocation7 + $0x148] sm:$0xff] }
  0x4e   :  { %166 = vmatprep.subr.mxu0 %v117_v60  ;;  %315 = vmatprep.subr.mxu1 %v222_v23  ;;  %v261_v59 = vld [vmem:[#allocation7 + $0x140] sm:$0xff]  ;;  %v260_v60 = vld [vmem:[#allocation7 + $0x138] sm:$0xff]  ;;  %v259_v61 = vld [vmem:[#allocation7 + $0x130] sm:$0xff] }
  0x4f   :  { %167 = vmatpush2.msra.mxu0 %v116_v62  ;;  %316 = vmatpush1.msra.mxu1 %v221_v25  ;;  %v258_v62 = vld [vmem:[#allocation7 + $0x128] sm:$0xff]  ;;  %v257_v63 = vld [vmem:[#allocation7 + $0x120] sm:$0xff]  ;;  %v255_v1 = vld [vmem:[#allocation7 + $0x110] sm:$0xff] }
  0x50   :  { %168 = vmatprep.subr.mxu0 %v115_v0  ;;  %317 = vmatprep.subr.mxu1 %v284_v27  ;;  %v256_v0 = vld [vmem:[#allocation7 + $0x118] sm:$0xff]  ;;  %v253_v3 = vld [vmem:[#allocation7 + $0x100] sm:$0xff] }
  0x51   :  { %169 = vmatpush2.msra.mxu0 %v114_v2  ;;  %318 = vmatpush2.msra.mxu1 %v283_v29  ;;  %v254_v2 = vld [vmem:[#allocation7 + $0x108] sm:$0xff] }
  0x52   :  { %170 = vmatprep.subr.mxu0 %v113_v4  ;;  %319 = vmatprep.subr.mxu1 %v282_v31  ;;  %v205_v4 = vlaneseq }
  0x53   :  { %171 = vmatpush2.msra.mxu0 %v112_v6  ;;  %320 = vmatpush2.msra.mxu1 %v281_v33 }
  0x54   :  { %172 = vmatprep.subr.mxu0 %v111_v8  ;;  %321 = vmatprep.subr.mxu1 %v280_v35  ;;  %v206_v5 = vshrl.u32 %v205_v4, 7  ;;  %v198_v8 = vld [vmem:[%s526_s3] sm:$0x3]  ;;  %s442_s3 = scalar_lea.vmem %s365_s11, 256 }
  0x55   :  { %173 = vmatpush2.msra.mxu0 %v110_v10  ;;  %322 = vmatpush2.msra.mxu1 %v279_v37  ;;  %p443_p1 = scmp.ne.s32.totalorder %s365_s11, %s442_s3  ;;  %p448_p3 = scmp.lt.s32.totalorder %s442_s3, %s442_s3 }
  0x56   :  { %174 = vmatprep.subr.mxu0 %v109_v12  ;;  %323 = vmatprep.subr.mxu1 %v278_v39  ;;  %v211_v6 = vsub.s32 1, %v206_v5  ;;  %v207_v7 = vsub.s32 0, %v206_v5 }
  0x57   :  { %175 = vmatpush2.msra.mxu0 %v108_v14  ;;  %324 = vmatpush2.msra.mxu1 %v277_v41  ;;  %p449_p4 = por %p448_p3, %p447_p2 }
  0x58   :  { %176 = vmatprep.subr.mxu0 %v107_v16  ;;  %325 = vmatprep.subr.mxu1 %v276_v43  ;;  %v212_v9 = vrot.slane %v198_v8, %v211_v6  ;;  %v208_v10 = vrot.slane %v198_v8, %v207_v7 }
  0x59   :  { %177 = vmatpush2.msra.mxu0 %v106_v18  ;;  %326 = vmatpush2.msra.mxu1 %v275_v45  ;;  %p450_p5 = pnand %p449_p4, %p443_p1 }
  0x5a   :  { %178 = vmatprep.subr.mxu0 %v105_v20  ;;  %327 = vmatprep.subr.mxu1 %v274_v46 }
  0x5b   :  { %179 = vmatpush2.msra.mxu0 %v104_v22  ;;  %328 = vmatpush2.msra.mxu1 %v273_v47 }
  0x5c   :  { %180 = vmatprep.subr.mxu0 %v103_v24  ;;  %329 = vmatprep.subr.mxu1 %v272_v48 }
  0x5d   :  { %181 = vmatpush2.msra.mxu0 %v102_v26  ;;  %330 = vmatpush2.msra.mxu1 %v271_v49 }
  0x5e   :  { %182 = vmatprep.subr.mxu0 %v101_v28  ;;  %331 = vmatprep.subr.mxu1 %v270_v50 }
  0x5f   :  { %183 = vmatpush2.msra.mxu0 %v100_v30  ;;  %332 = vmatpush2.msra.mxu1 %v269_v51 }
  0x60   :  { %184 = vmatprep.subr.mxu0 %v99_v32  ;;  %333 = vmatprep.subr.mxu1 %v268_v52 }
  0x61   :  { %185 = vmatpush2.msra.mxu0 %v98_v34  ;;  %334 = vmatpush2.msra.mxu1 %v267_v53 }
  0x62   :  { %186 = vmatprep.subr.mxu0 %v97_v36  ;;  %335 = vmatprep.subr.mxu1 %v266_v54 }
  0x63   :  { %187 = vmatpush2.msra.mxu0 %v96_v38  ;;  %336 = vmatpush2.msra.mxu1 %v265_v55 }
  0x64   :  { %188 = vmatprep.subr.mxu0 %v95_v40  ;;  %337 = vmatprep.subr.mxu1 %v264_v56 }
  0x65   :  { %189 = vmatpush2.msra.mxu0 %v94_v42  ;;  %338 = vmatpush2.msra.mxu1 %v263_v57 }
  0x66   :  { %191 = vmatmul.mubr.f32.vlgmr.msra.gmra.mxu0 %v60_v44  ;;  %339 = vmatprep.subr.mxu1 %v262_v58 }
  0x67   :  { %340 = vmatpush2.msra.mxu1 %v261_v59 }
  0x68   :  { %341 = vmatprep.subr.mxu1 %v260_v60 }
  0x69   :  { %342 = vmatpush2.msra.mxu1 %v259_v61 }
  0x6a   :  { %343 = vmatprep.subr.mxu1 %v258_v62 }
  0x6b   :  { %344 = vmatpush2.msra.mxu1 %v257_v63 }
  0x6c   :  { %345 = vmatprep.subr.mxu1 %v256_v0 }
  0x6d   :  { %346 = vmatpush2.msra.mxu1 %v255_v1 }
  0x6e   :  { %347 = vmatprep.subr.mxu1 %v254_v2 }
  0x6f   :  { %348 = vmatpush2.msra.mxu1 %v253_v3 }
  0xa9   :  { %v202_v11 = vpop.permute.xlu0 %201 }
  0xaa   :  { %v216_v12 = vmul.f32 %v212_v9, %v202_v11  ;;  %v215_v13 = vmul.f32 %v208_v10, %v202_v11 }
  0xac   :  { %v218_v14 = vsub.f32 1.0, %v216_v12  ;;  %v217_v15 = vsub.f32 1.0, %v215_v13 }
 0x126   :  { %v192_v16 = vpop.f32.mrf.mxu0 }
 0x127   :  { %v219_v19 = vmul.f32 %v217_v15, %v192_v16 }
 0x128   :  { %v194_v17 = vpop.f32.mrf.mxu0 }
 0x129   :  { %v220_v18 = vmul.f32 %v218_v14, %v194_v17 }
 0x12b   :  { %349 = vmatprep.mubr.f32.mxu1 %v220_v18 }
 0x12c   :  { %350 = vmatmul.mubr.f32.vlgmr.msra.gmra.mxu1 %v219_v19 }
 0x1ec   :  { %v351_v20 = vpop.f32.mrf.mxu1 }
 0x1ed   :  { %356 = vst [vmem:[#allocation8] sm:$0xff] %v351_v20 }
 0x1ee   :  { %v353_v21 = vpop.f32.mrf.mxu1 }
 0x1ef   :  { %357 = vst [vmem:[#allocation8 + $0x8] sm:$0xff] %v353_v21 }
 0x1f0   :  { %453 = shalt.err (!%p450_p5)
}
 0x1f1   :  { %367 = dma.vmem_to_hbm [thread:$0]  %s365_s11, 256, %s528_s5, [#allocation4]  }
 0x1f2   :  { %466 = dma.done.wait [#allocation4], 256  }
 0x1f3   :  { %467 = vsyncadd [#allocation4], 4294967040 }
 0x1f4   :  { %371 = vsyncpa [#allocation3], 1 }
 0x1f5   :  { %372 = vsyncpa [#allocation6], 1 }
 0x1f6   :  { %373 = vsyncpa [#allocation4], 1 }

</bundles_post_ra>
